<compile_context>
chip_gen: v6e
topology: v6e:2x2x1
jax: 0.10.0
libtpu: 0.0.40
codegen_flags: <defaults>
</compile_context>

<pallas_src>
import functools

import jax
import jax.numpy as jnp
from jax.experimental import pallas as pl
from jax.experimental.pallas import tpu as pltpu


_LANE = 128                        # last dim should be a multiple of this (lane width)
_SUBLANE = 8                       # second-to-last block-dim alignment
_VMEM_BUDGET = 40 * 1024 * 1024    # conservative across v5e/v6e/v7x (v7x has 64 MiB VMEM)


def _round_up(v, m):
    return (v + m - 1) // m * m


def _pad_to(a, shape):
    pads = [(0, t - s) for s, t in zip(a.shape, shape)]
    if all(p == (0, 0) for p in pads):
        return a
    return jnp.pad(a, pads)


def _self_combiner_kernel(x_ref, y_ref,
                          w1_ref, b1_ref,
                          w2_ref, b2_ref,
                          wc_ref, bc_ref,
                          o_ref):
    # nn1 layer 1: Linear(second_nhid -> nhid) + ReLU  (f32 accumulation, f32 epilogue)
    h = jnp.dot(y_ref[...], w1_ref[...], preferred_element_type=jnp.float32)
    h = jnp.maximum(h + b1_ref[...], 0.0)
    # nn1 layer 2: Linear(nhid -> nhid) + ReLU
    h = jnp.dot(h.astype(w2_ref.dtype), w2_ref[...],
                preferred_element_type=jnp.float32)
    h = jnp.maximum(h + b2_ref[...], 0.0)
    # combine: Linear(2*nhid -> nhid) + ReLU, concat folded into two matmuls
    o = jnp.dot(x_ref[...], wc_ref[0], preferred_element_type=jnp.float32)
    o = o + jnp.dot(h.astype(wc_ref.dtype), wc_ref[1],
                    preferred_element_type=jnp.float32)
    o = jnp.maximum(o + bc_ref[...], 0.0)
    o_ref[...] = o.astype(o_ref.dtype)


@functools.partial(jax.jit, static_argnames=("block_rows", "compute_dtype"))
def self_combiner(x, y, params, block_rows=512, compute_dtype=jnp.bfloat16):
    """x: [N, nhid], y: [N, second_nhid] -> [N, nhid]."""
    w1, b1, w2, b2, wc, bc = (params["w1"], params["b1"], params["w2"],
                              params["b2"], params["wc"], params["bc"])
    N, nhid = x.shape
    second_nhid = y.shape[-1]
    out_dtype = x.dtype
    cdt = jnp.dtype(compute_dtype)

    # ---- lane-dense padding of the feature dims (multiples of 128) ----
    nhid_p = _round_up(nhid, _LANE)
    snhid_p = _round_up(second_nhid, _LANE)

    x_p = _pad_to(x, (N, nhid_p)).astype(cdt)
    y_p = _pad_to(y, (N, snhid_p)).astype(cdt)
    w1_p = _pad_to(w1, (snhid_p, nhid_p)).astype(cdt)
    w2_p = _pad_to(w2, (nhid_p, nhid_p)).astype(cdt)
    # combine weight (2*nhid, nhid) -> stacked (2, nhid_p, nhid_p): block 0 acts on x,
    # block 1 acts on h = nn1(y).  The reshape of a contiguous array is free.
    wc_p = _pad_to(wc.reshape(2, nhid, nhid), (2, nhid_p, nhid_p)).astype(cdt)
    # Biases stay f32 (added after the f32 accumulation).
    b1_p = _pad_to(b1.reshape(1, -1), (1, nhid_p)).astype(jnp.float32)
    b2_p = _pad_to(b2.reshape(1, -1), (1, nhid_p)).astype(jnp.float32)
    bc_p = _pad_to(bc.reshape(1, -1), (1, nhid_p)).astype(jnp.float32)

    # ---- pick the row tile: as large as fits a conservative VMEM budget ----
    w_bytes = ((snhid_p * nhid_p + 3 * nhid_p * nhid_p) * cdt.itemsize  # w1,w2,wc (1 buffer)
               + 3 * nhid_p * 4)                                        # f32 biases
    per_row = (2 * (nhid_p + snhid_p) * cdt.itemsize                    # x, y (double-buffered)
               + 2 * nhid_p * jnp.dtype(out_dtype).itemsize             # out (double-buffered)
               + 3 * nhid_p * 4)                                        # f32 intermediates
    tm_cap = max(_SUBLANE, (_VMEM_BUDGET - w_bytes) // per_row)
    tm = min(block_rows, N, tm_cap)
    if tm < N:
        tm = max(_SUBLANE, (tm // _SUBLANE) * _SUBLANE)   # keep sublane-aligned blocks
    # v7x has 2 TensorCores per chip: give the "parallel" axis >= 2 blocks for large N.
    if N >= 4 * _LANE and pl.cdiv(N, tm) < 2:
        tm = _round_up(pl.cdiv(N, 2), _SUBLANE)
    grid = (pl.cdiv(N, tm),)

    # TODO(synk): for nhid so large that w_bytes alone exceeds the budget, add an
    # output-column grid axis instead of relying on a bigger VMEM limit (v7x: 64 MiB).
    vmem_need = w_bytes + tm * per_row
    vmem_limit = int(min(max(vmem_need + (8 << 20), 32 << 20), 64 << 20))

    flops = 2 * N * (snhid_p * nhid_p + 3 * nhid_p * nhid_p)
    bytes_accessed = (x_p.size * x_p.dtype.itemsize + y_p.size * y_p.dtype.itemsize
                      + (w1_p.size + w2_p.size + wc_p.size) * cdt.itemsize
                      + 3 * nhid_p * 4
                      + N * nhid_p * jnp.dtype(out_dtype).itemsize)
    cost = pl.CostEstimate(flops=flops, transcendentals=0,
                           bytes_accessed=bytes_accessed)

    wmode = pl.Buffered(1)          # resident weights: constant index_map -> single buffer
    full2 = lambda i: (0, 0)
    full3 = lambda i: (0, 0, 0)
    in_specs = [
        pl.BlockSpec((tm, nhid_p), lambda i: (i, 0)),                   # x rows
        pl.BlockSpec((tm, snhid_p), lambda i: (i, 0)),                  # y rows
        pl.BlockSpec((snhid_p, nhid_p), full2, pipeline_mode=wmode),    # w1
        pl.BlockSpec((1, nhid_p), full2),                               # b1
        pl.BlockSpec((nhid_p, nhid_p), full2, pipeline_mode=wmode),     # w2
        pl.BlockSpec((1, nhid_p), full2),                               # b2
        pl.BlockSpec((2, nhid_p, nhid_p), full3, pipeline_mode=wmode),  # wc (stacked)
        pl.BlockSpec((1, nhid_p), full2),                               # bc
    ]

    out_p = pl.pallas_call(
        _self_combiner_kernel,
        out_shape=jax.ShapeDtypeStruct((N, nhid_p), out_dtype),
        grid_spec=pltpu.PrefetchScalarGridSpec(
            num_scalar_prefetch=0,
            grid=grid,
            in_specs=in_specs,
            out_specs=pl.BlockSpec((tm, nhid_p), lambda i: (i, 0)),
        ),
        compiler_params=pltpu.CompilerParams(
            dimension_semantics=("parallel",),
            vmem_limit_bytes=vmem_limit),
        cost_estimate=cost,
    )(x_p, y_p, w1_p, b1_p, w2_p, b2_p, wc_p, bc_p)

    return out_p[:, :nhid] if nhid_p != nhid else out_p


def init_params(key, nhid, second_nhid, dtype=jnp.float32):
    """Deterministic PyTorch-Linear-style init: U(-1/sqrt(fan_in), 1/sqrt(fan_in))."""
    ks = jax.random.split(key, 6)

    def lin(kw, kb, fan_in, fan_out):
        bound = 1.0 / jnp.sqrt(float(fan_in))
        w = jax.random.uniform(kw, (fan_in, fan_out), dtype, -bound, bound)
        b = jax.random.uniform(kb, (fan_out,), dtype, -bound, bound)
        return w, b

    w1, b1 = lin(ks[0], ks[1], second_nhid, nhid)   # nn1 layer 1
    w2, b2 = lin(ks[2], ks[3], nhid, nhid)          # nn1 layer 2
    wc, bc = lin(ks[4], ks[5], 2 * nhid, nhid)      # combine
    return dict(w1=w1, b1=b1, w2=w2, b2=b2, wc=wc, bc=bc)


def _reference(x, y, p):
    h = jnp.maximum(y @ p["w1"] + p["b1"], 0.0)
    h = jnp.maximum(h @ p["w2"] + p["b2"], 0.0)
    cat = jnp.concatenate([x, h], axis=-1)
    return jnp.maximum(cat @ p["wc"] + p["bc"], 0.0)


if __name__ == "__main__":
    N, nhid, second_nhid = 8, 32, 32
    key = jax.random.PRNGKey(0)
    kx, ky, kp = jax.random.split(key, 3)
    x = jax.random.normal(kx, (N, nhid), jnp.float32)
    y = jax.random.normal(ky, (N, second_nhid), jnp.float32)
    params = init_params(kp, nhid, second_nhid)

    ref = _reference(x, y, params)

    # Exact path: f32 compute must match the reference tightly.
    out_f32 = jax.block_until_ready(
        self_combiner(x, y, params, compute_dtype=jnp.float32))
    assert out_f32.shape == (N, nhid)
    assert jnp.allclose(out_f32, ref, atol=1e-5, rtol=1e-5), "f32 mismatch vs reference"

    # Default fast path: bf16 operands on the MXU with f32 accumulation.
    out_bf16 = jax.block_until_ready(self_combiner(x, y, params))
    assert out_bf16.shape == (N, nhid)
    assert jnp.allclose(out_bf16, ref, atol=3e-2, rtol=3e-2), "bf16 mismatch vs reference"

    print("KERNEL_OK")
</pallas_src>

<mosaic_0001>
module attributes {stable_mosaic.version = 11 : i64} {
  func.func @_self_combiner_kernel(%arg0: i32, %arg1: memref<8x128xf32, #tpu.memory_space<vmem>>, %arg2: memref<8x128xf32, #tpu.memory_space<vmem>>, %arg3: memref<128x128xf32, #tpu.memory_space<vmem>>, %arg4: memref<1x128xf32, #tpu.memory_space<vmem>>, %arg5: memref<128x128xf32, #tpu.memory_space<vmem>>, %arg6: memref<1x128xf32, #tpu.memory_space<vmem>>, %arg7: memref<2x128x128xf32, #tpu.memory_space<vmem>>, %arg8: memref<1x128xf32, #tpu.memory_space<vmem>>, %arg9: memref<8x128xf32, #tpu.memory_space<vmem>>) attributes {dimension_semantics = [#tpu.dimension_semantics<parallel>], iteration_bounds = array<i64: 1>, scalar_prefetch = 0 : i64, scratch_operands = 0 : i64, tpu.core_type = #tpu.core_type<tc>, window_params = [{transform_indices = @transform_0, window_bounds = array<i64: 8, 128>}, {transform_indices = @transform_1, window_bounds = array<i64: 8, 128>}, {pipeline_mode = #tpu.pipeline_mode<synchronous>, transform_indices = @transform_2, window_bounds = array<i64: 128, 128>}, {pipeline_mode = #tpu.pipeline_mode<synchronous>, transform_indices = @transform_3, window_bounds = array<i64: 1, 128>}, {pipeline_mode = #tpu.pipeline_mode<synchronous>, transform_indices = @transform_4, window_bounds = array<i64: 128, 128>}, {pipeline_mode = #tpu.pipeline_mode<synchronous>, transform_indices = @transform_5, window_bounds = array<i64: 1, 128>}, {pipeline_mode = #tpu.pipeline_mode<synchronous>, transform_indices = @transform_6, window_bounds = array<i64: 2, 128, 128>}, {pipeline_mode = #tpu.pipeline_mode<synchronous>, transform_indices = @transform_7, window_bounds = array<i64: 1, 128>}, {transform_indices = @transform_8, window_bounds = array<i64: 8, 128>}]} {
    %c0 = arith.constant 0 : index
    %c0_0 = arith.constant 0 : index
    %0 = vector.load %arg2[%c0, %c0_0] : memref<8x128xf32, #tpu.memory_space<vmem>>, vector<8x128xf32>
    %c0_1 = arith.constant 0 : index
    %c0_2 = arith.constant 0 : index
    %1 = vector.load %arg3[%c0_1, %c0_2] : memref<128x128xf32, #tpu.memory_space<vmem>>, vector<128x128xf32>
    %cst = arith.constant dense<0.000000e+00> : vector<8x128xf32>
    %2 = tpu.matmul %0, %1, %cst {dimension_numbers = #tpu.dot_dimension_numbers<[1], [0], [0], [1], [0, 0, 1, 1], [], []>} : vector<8x128xf32>, vector<128x128xf32>, vector<8x128xf32> -> vector<8x128xf32>
    %c0_3 = arith.constant 0 : index
    %c0_4 = arith.constant 0 : index
    %3 = vector.load %arg4[%c0_3, %c0_4] : memref<1x128xf32, #tpu.memory_space<vmem>>, vector<1x128xf32>
    %4 = vector.broadcast %3 : vector<1x128xf32> to vector<8x128xf32>
    %5 = arith.addf %2, %4 : vector<8x128xf32>
    %cst_5 = arith.constant 0.000000e+00 : f32
    %6 = vector.broadcast %cst_5 : f32 to vector<8x128xf32>
    %7 = arith.maximumf %5, %6 : vector<8x128xf32>
    %c0_6 = arith.constant 0 : index
    %c0_7 = arith.constant 0 : index
    %8 = vector.load %arg5[%c0_6, %c0_7] : memref<128x128xf32, #tpu.memory_space<vmem>>, vector<128x128xf32>
    %cst_8 = arith.constant dense<0.000000e+00> : vector<8x128xf32>
    %9 = tpu.matmul %7, %8, %cst_8 {dimension_numbers = #tpu.dot_dimension_numbers<[1], [0], [0], [1], [0, 0, 1, 1], [], []>} : vector<8x128xf32>, vector<128x128xf32>, vector<8x128xf32> -> vector<8x128xf32>
    %c0_9 = arith.constant 0 : index
    %c0_10 = arith.constant 0 : index
    %10 = vector.load %arg6[%c0_9, %c0_10] : memref<1x128xf32, #tpu.memory_space<vmem>>, vector<1x128xf32>
    %11 = vector.broadcast %10 : vector<1x128xf32> to vector<8x128xf32>
    %12 = arith.addf %9, %11 : vector<8x128xf32>
    %cst_11 = arith.constant 0.000000e+00 : f32
    %13 = vector.broadcast %cst_11 : f32 to vector<8x128xf32>
    %14 = arith.maximumf %12, %13 : vector<8x128xf32>
    %c0_12 = arith.constant 0 : index
    %c0_13 = arith.constant 0 : index
    %15 = vector.load %arg1[%c0_12, %c0_13] : memref<8x128xf32, #tpu.memory_space<vmem>>, vector<8x128xf32>
    %c0_14 = arith.constant 0 : index
    %c0_15 = arith.constant 0 : index
    %c0_16 = arith.constant 0 : index
    %16 = vector.load %arg7[%c0_14, %c0_15, %c0_16] : memref<2x128x128xf32, #tpu.memory_space<vmem>>, vector<1x128x128xf32>
    %17 = vector.shape_cast %16 : vector<1x128x128xf32> to vector<128x128xf32>
    %cst_17 = arith.constant dense<0.000000e+00> : vector<8x128xf32>
    %18 = tpu.matmul %15, %17, %cst_17 {dimension_numbers = #tpu.dot_dimension_numbers<[1], [0], [0], [1], [0, 0, 1, 1], [], []>} : vector<8x128xf32>, vector<128x128xf32>, vector<8x128xf32> -> vector<8x128xf32>
    %c1 = arith.constant 1 : index
    %c0_18 = arith.constant 0 : index
    %c0_19 = arith.constant 0 : index
    %19 = vector.load %arg7[%c1, %c0_18, %c0_19] : memref<2x128x128xf32, #tpu.memory_space<vmem>>, vector<1x128x128xf32>
    %20 = vector.shape_cast %19 : vector<1x128x128xf32> to vector<128x128xf32>
    %cst_20 = arith.constant dense<0.000000e+00> : vector<8x128xf32>
    %21 = tpu.matmul %14, %20, %cst_20 {dimension_numbers = #tpu.dot_dimension_numbers<[1], [0], [0], [1], [0, 0, 1, 1], [], []>} : vector<8x128xf32>, vector<128x128xf32>, vector<8x128xf32> -> vector<8x128xf32>
    %22 = arith.addf %18, %21 : vector<8x128xf32>
    %c0_21 = arith.constant 0 : index
    %c0_22 = arith.constant 0 : index
    %23 = vector.load %arg8[%c0_21, %c0_22] : memref<1x128xf32, #tpu.memory_space<vmem>>, vector<1x128xf32>
    %24 = vector.broadcast %23 : vector<1x128xf32> to vector<8x128xf32>
    %25 = arith.addf %22, %24 : vector<8x128xf32>
    %cst_23 = arith.constant 0.000000e+00 : f32
    %26 = vector.broadcast %cst_23 : f32 to vector<8x128xf32>
    %27 = arith.maximumf %25, %26 : vector<8x128xf32>
    %c0_24 = arith.constant 0 : index
    %c0_25 = arith.constant 0 : index
    %28 = vector.load %arg9[%c0_24, %c0_25] : memref<8x128xf32, #tpu.memory_space<vmem>>, vector<8x128xf32>
    tpu.vector_store %arg9[%c0_24, %c0_25], %27 {strides = array<i32>} : memref<8x128xf32, #tpu.memory_space<vmem>>, vector<8x128xf32>,
    return
  }
  func.func @transform_0(%arg0: i32) -> (i32, i32) {
    %c0_i32 = arith.constant 0 : i32
    %c0_i32_0 = arith.constant 0 : i32
    return %arg0, %c0_i32 : i32, i32
  }
  func.func @transform_1(%arg0: i32) -> (i32, i32) {
    %c0_i32 = arith.constant 0 : i32
    %c0_i32_0 = arith.constant 0 : i32
    return %arg0, %c0_i32 : i32, i32
  }
  func.func @transform_2(%arg0: i32) -> (i32, i32) {
    %c0_i32 = arith.constant 0 : i32
    %c0_i32_0 = arith.constant 0 : i32
    %c0_i32_1 = arith.constant 0 : i32
    return %c0_i32, %c0_i32_0 : i32, i32
  }
  func.func @transform_3(%arg0: i32) -> (i32, i32) {
    %c0_i32 = arith.constant 0 : i32
    %c0_i32_0 = arith.constant 0 : i32
    %c0_i32_1 = arith.constant 0 : i32
    return %c0_i32, %c0_i32_0 : i32, i32
  }
  func.func @transform_4(%arg0: i32) -> (i32, i32) {
    %c0_i32 = arith.constant 0 : i32
    %c0_i32_0 = arith.constant 0 : i32
    %c0_i32_1 = arith.constant 0 : i32
    return %c0_i32, %c0_i32_0 : i32, i32
  }
  func.func @transform_5(%arg0: i32) -> (i32, i32) {
    %c0_i32 = arith.constant 0 : i32
    %c0_i32_0 = arith.constant 0 : i32
    %c0_i32_1 = arith.constant 0 : i32
    return %c0_i32, %c0_i32_0 : i32, i32
  }
  func.func @transform_6(%arg0: i32) -> (i32, i32, i32) {
    %c0_i32 = arith.constant 0 : i32
    %c0_i32_0 = arith.constant 0 : i32
    %c0_i32_1 = arith.constant 0 : i32
    %c0_i32_2 = arith.constant 0 : i32
    return %c0_i32, %c0_i32_0, %c0_i32_1 : i32, i32, i32
  }
  func.func @transform_7(%arg0: i32) -> (i32, i32) {
    %c0_i32 = arith.constant 0 : i32
    %c0_i32_0 = arith.constant 0 : i32
    %c0_i32_1 = arith.constant 0 : i32
    return %c0_i32, %c0_i32_0 : i32, i32
  }
  func.func @transform_8(%arg0: i32) -> (i32, i32) {
    %c0_i32 = arith.constant 0 : i32
    %c0_i32_0 = arith.constant 0 : i32
    return %arg0, %c0_i32 : i32, i32
  }
}

</mosaic_0001>

<bundles_post_ra>
// kernel: self_combiner.1
= control target key start
LH: loop header
LB: loop body
LE: loop exit
PB: predicated region body
PF: predicated region fallthrough
CT: control target
= control target key end

     0   :  { %v669_v1 = vmov 0.0   ;;  %vm670_vm0 = vmmov 0   ;;  %s999_s0 = inlined_call_operand.vmem [shape: f32[8,128], index: 0, kind: input, shape index: {}]   ;;  %s1000_s1 = inlined_call_operand.vmem [shape: f32[8,128], index: 1, kind: input, shape index: {}]   ;;  %s1001_s2 = inlined_call_operand.vmem [shape: f32[128,128], index: 2, kind: input, shape index: {}]   ;;  %s1002_s3 = inlined_call_operand.vmem [shape: f32[1,128], index: 3, kind: input, shape index: {}]   ;;  %s1003_s4 = inlined_call_operand.vmem [shape: f32[128,128], index: 4, kind: input, shape index: {}]   ;;  %s1004_s5 = inlined_call_operand.vmem [shape: f32[1,128], index: 5, kind: input, shape index: {}]   ;;  %s1005_s6 = inlined_call_operand.vmem [shape: f32[2,128,128], index: 6, kind: input, shape index: {}]   ;;  %s1006_s7 = inlined_call_operand.vmem [shape: f32[1,128], index: 7, kind: input, shape index: {}]   ;;  %s1007_s8 = inlined_call_operand.hbm [shape: f32[8,128], index: 8, kind: output, shape index: {}]  }
   0x1   :  { %v46_v0 = vld [vmem:[%s1001_s2 + $0x78] sm:$0xff]  ;;  %504 = vmatprep.subr.mxu0 %v669_v1  ;;  %v45_v2 = vld [vmem:[%s1001_s2 + $0x70] sm:$0xff]  ;;  %536 = vmatprep.mubr.msk.f32.mxu0 %vm670_vm0, %v669_v1  ;;  %v44_v3 = vld [vmem:[%s1001_s2 + $0x68] sm:$0xff] }
   0x2   :  { %505 = vmatpush3.msra.mxu0 %v46_v0  ;;  %539 = vmatprep.subr.mxu1 %v669_v1  ;;  %v43_v4 = vld [vmem:[%s1001_s2 + $0x60] sm:$0xff]  ;;  %v140_v5 = vld [vmem:[%s1003_s4 + $0x78] sm:$0xff]  ;;  %v139_v6 = vld [vmem:[%s1003_s4 + $0x70] sm:$0xff] }
   0x3   :  { %506 = vmatprep.subr.mxu0 %v669_v1  ;;  %571 = vmatprep.mubr.msk.f32.mxu1 %vm670_vm0, %v669_v1  ;;  %v42_v7 = vld [vmem:[%s1001_s2 + $0x58] sm:$0xff]  ;;  %v138_v8 = vld [vmem:[%s1003_s4 + $0x68] sm:$0xff]  ;;  %v41_v9 = vld [vmem:[%s1001_s2 + $0x50] sm:$0xff] }
   0x4   :  { %507 = vmatpush3.msra.mxu0 %v45_v2  ;;  %540 = vmatpush3.msra.mxu1 %v140_v5  ;;  %v137_v10 = vld [vmem:[%s1003_s4 + $0x60] sm:$0xff] }
   0x5   :  { %508 = vmatprep.subr.mxu0 %v669_v1  ;;  %541 = vmatprep.subr.mxu1 %v669_v1 }
   0x6   :  { %509 = vmatpush3.msra.mxu0 %v44_v3  ;;  %542 = vmatpush3.msra.mxu1 %v139_v6 }
   0x7   :  { %510 = vmatprep.subr.mxu0 %v669_v1  ;;  %543 = vmatprep.subr.mxu1 %v669_v1 }
   0x8   :  { %511 = vmatpush3.msra.mxu0 %v43_v4  ;;  %544 = vmatpush3.msra.mxu1 %v138_v8 }
   0x9   :  { %512 = vmatprep.subr.mxu0 %v669_v1 }
   0xa   :  { %513 = vmatpush3.msra.mxu0 %v42_v7 }
   0xb   :  { %13 = vsyncpa [#allocation3], 0  ;;  %514 = vmatprep.subr.mxu0 %v669_v1  ;;  %v40_v11 = vld [vmem:[%s1001_s2 + $0x48] sm:$0xff]  ;;  %545 = vmatprep.subr.mxu1 %v669_v1  ;;  %v136_v12 = vld [vmem:[%s1003_s4 + $0x58] sm:$0xff] }
   0xc   :  { %515 = vmatpush3.msra.mxu0 %v41_v9  ;;  %546 = vmatpush3.msra.mxu1 %v137_v10  ;;  %v39_v13 = vld [vmem:[%s1001_s2 + $0x40] sm:$0xff]  ;;  %v135_v14 = vld [vmem:[%s1003_s4 + $0x50] sm:$0xff]  ;;  %v38_v15 = vld [vmem:[%s1001_s2 + $0x38] sm:$0xff] }
   0xd   :  { %516 = vmatprep.subr.mxu0 %v669_v1  ;;  %547 = vmatprep.subr.mxu1 %v669_v1  ;;  %v134_v16 = vld [vmem:[%s1003_s4 + $0x48] sm:$0xff]  ;;  %v37_v17 = vld [vmem:[%s1001_s2 + $0x30] sm:$0xff]  ;;  %v133_v18 = vld [vmem:[%s1003_s4 + $0x40] sm:$0xff] }
   0xe   :  { %517 = vmatpush3.msra.mxu0 %v40_v11  ;;  %548 = vmatpush3.msra.mxu1 %v136_v12  ;;  %v36_v19 = vld [vmem:[%s1001_s2 + $0x28] sm:$0xff]  ;;  %v132_v20 = vld [vmem:[%s1003_s4 + $0x38] sm:$0xff]  ;;  %v35_v21 = vld [vmem:[%s1001_s2 + $0x20] sm:$0xff] }
   0xf   :  { %518 = vmatprep.subr.mxu0 %v669_v1  ;;  %549 = vmatprep.subr.mxu1 %v669_v1  ;;  %v131_v22 = vld [vmem:[%s1003_s4 + $0x30] sm:$0xff]  ;;  %v34_v23 = vld [vmem:[%s1001_s2 + $0x18] sm:$0xff]  ;;  %v130_v24 = vld [vmem:[%s1003_s4 + $0x28] sm:$0xff] }
  0x10   :  { %519 = vmatpush3.msra.mxu0 %v39_v13  ;;  %550 = vmatpush3.msra.mxu1 %v135_v14  ;;  %v33_v25 = vld [vmem:[%s1001_s2 + $0x10] sm:$0xff]  ;;  %v129_v26 = vld [vmem:[%s1003_s4 + $0x20] sm:$0xff]  ;;  %v32_v27 = vld [vmem:[%s1001_s2 + $0x8] sm:$0xff] }
  0x11   :  { %520 = vmatprep.subr.mxu0 %v669_v1  ;;  %551 = vmatprep.subr.mxu1 %v669_v1  ;;  %v128_v28 = vld [vmem:[%s1003_s4 + $0x18] sm:$0xff]  ;;  %v31_v29 = vld [vmem:[%s1001_s2] sm:$0xff]  ;;  %v127_v31 = vld [vmem:[%s1003_s4 + $0x10] sm:$0xff] }
  0x12   :  { %521 = vmatpush3.msra.mxu0 %v38_v15  ;;  %552 = vmatpush3.msra.mxu1 %v134_v16  ;;  %v30_v30 = vld [vmem:[%s1000_s1] sm:$0xff]  ;;  %v126_v32 = vld [vmem:[%s1003_s4 + $0x8] sm:$0xff]  ;;  %v434_v34 = vld [vmem:[%s1005_s6 + $0xf8] sm:$0xff] }
  0x13   :  { %522 = vmatprep.subr.mxu0 %v669_v1  ;;  %553 = vmatprep.subr.mxu1 %v669_v1  ;;  %v125_v33 = vld [vmem:[%s1003_s4] sm:$0xff]  ;;  %v433_v35 = vld [vmem:[%s1005_s6 + $0xf0] sm:$0xff]  ;;  %v432_v36 = vld [vmem:[%s1005_s6 + $0xe8] sm:$0xff] }
  0x14   :  { %523 = vmatpush3.msra.mxu0 %v37_v17  ;;  %554 = vmatpush3.msra.mxu1 %v133_v18  ;;  %v431_v37 = vld [vmem:[%s1005_s6 + $0xe0] sm:$0xff]  ;;  %v430_v38 = vld [vmem:[%s1005_s6 + $0xd8] sm:$0xff]  ;;  %v429_v39 = vld [vmem:[%s1005_s6 + $0xd0] sm:$0xff] }
  0x15   :  { %524 = vmatprep.subr.mxu0 %v669_v1  ;;  %555 = vmatprep.subr.mxu1 %v669_v1  ;;  %v428_v40 = vld [vmem:[%s1005_s6 + $0xc8] sm:$0xff]  ;;  %v427_v41 = vld [vmem:[%s1005_s6 + $0xc0] sm:$0xff]  ;;  %v426_v42 = vld [vmem:[%s1005_s6 + $0xb8] sm:$0xff] }
  0x16   :  { %525 = vmatpush3.msra.mxu0 %v36_v19  ;;  %556 = vmatpush3.msra.mxu1 %v132_v20  ;;  %v425_v43 = vld [vmem:[%s1005_s6 + $0xb0] sm:$0xff]  ;;  %v424_v44 = vld [vmem:[%s1005_s6 + $0xa8] sm:$0xff]  ;;  %v423_v45 = vld [vmem:[%s1005_s6 + $0xa0] sm:$0xff] }
  0x17   :  { %526 = vmatprep.subr.mxu0 %v669_v1  ;;  %557 = vmatprep.subr.mxu1 %v669_v1  ;;  %v422_v46 = vld [vmem:[%s1005_s6 + $0x98] sm:$0xff]  ;;  %v417_v47 = vld [vmem:[%s1002_s3] ss:$0 sm:$0xff]  ;;  %v234_v53 = vld [vmem:[%s1005_s6 + $0x70] sm:$0xff] }
  0x18   :  { %527 = vmatpush3.msra.mxu0 %v35_v21  ;;  %558 = vmatpush3.msra.mxu1 %v131_v22  ;;  %v235_v52 = vld [vmem:[%s1005_s6 + $0x78] sm:$0xff]  ;;  %v233_v54 = vld [vmem:[%s1005_s6 + $0x68] sm:$0xff]  ;;  %v232_v55 = vld [vmem:[%s1005_s6 + $0x60] sm:$0xff] }
  0x19   :  { %528 = vmatprep.subr.mxu0 %v669_v1  ;;  %559 = vmatprep.subr.mxu1 %v669_v1  ;;  %v231_v56 = vld [vmem:[%s1005_s6 + $0x58] sm:$0xff]  ;;  %v230_v57 = vld [vmem:[%s1005_s6 + $0x50] sm:$0xff]  ;;  %v229_v58 = vld [vmem:[%s1005_s6 + $0x48] sm:$0xff] }
  0x1a   :  { %529 = vmatpush3.msra.mxu0 %v34_v23  ;;  %560 = vmatpush3.msra.mxu1 %v130_v24  ;;  %v228_v59 = vld [vmem:[%s1005_s6 + $0x40] sm:$0xff]  ;;  %v227_v60 = vld [vmem:[%s1005_s6 + $0x38] sm:$0xff]  ;;  %v226_v61 = vld [vmem:[%s1005_s6 + $0x30] sm:$0xff] }
  0x1b   :  { %530 = vmatprep.subr.mxu0 %v669_v1  ;;  %561 = vmatprep.subr.mxu1 %v669_v1  ;;  %v225_v62 = vld [vmem:[%s1005_s6 + $0x28] sm:$0xff]  ;;  %v224_v63 = vld [vmem:[%s1005_s6 + $0x20] sm:$0xff]  ;;  %v223_v0 = vld [vmem:[%s1005_s6 + $0x18] sm:$0xff] }
  0x1c   :  { %531 = vmatpush3.msra.mxu0 %v33_v25  ;;  %562 = vmatpush3.msra.mxu1 %v129_v26  ;;  %v222_v2 = vld [vmem:[%s1005_s6 + $0x10] sm:$0xff]  ;;  %v221_v4 = vld [vmem:[%s1005_s6 + $0x8] sm:$0xff]  ;;  %v220_v6 = vld [vmem:[%s1005_s6] sm:$0xff] }
  0x1d   :  { %532 = vmatprep.subr.mxu0 %v669_v1  ;;  %563 = vmatprep.subr.mxu1 %v669_v1  ;;  %v421_v3 = vld [vmem:[%s1005_s6 + $0x90] sm:$0xff]  ;;  %v420_v5 = vld [vmem:[%s1005_s6 + $0x88] sm:$0xff]  ;;  %v219_v7 = vld [vmem:[%s999_s0] sm:$0xff] }
  0x1e   :  { %533 = vmatpush3.msra.mxu0 %v32_v27  ;;  %564 = vmatpush3.msra.mxu1 %v128_v28  ;;  %v419_v8 = vld [vmem:[%s1005_s6 + $0x80] sm:$0xff]  ;;  %s671_s6 = smov [#allocation2]  }
  0x1f   :  { %534 = vmatprep.subr.mxu0 %v669_v1  ;;  %565 = vmatprep.subr.mxu1 %v669_v1  ;;  %v418_v9 = vld [vmem:[%s1004_s5] ss:$0 sm:$0xff]  ;;  %s409_s2 = sshll.u32 %s671_s6, 4  ;;  %s410_s2 = int_to_ptr.vmem [resolvable:$true] %s409_s2 }
  0x20   :  { %535 = vmatpush3.msra.mxu0 %v31_v29  ;;  %566 = vmatpush3.msra.mxu1 %v127_v31  ;;  %s647_s5 = scalar_lea.vmem %s410_s2, 128  ;;  %p652_p1 = scmp.lt.s32.totalorder %s410_s2, %s410_s2 }
  0x21   :  { %537 = vmatmul.mubr.f32.vlgmr.msra.gmra.mxu0 %v30_v30  ;;  %574 = vmatprep.subr.mxu0 %v669_v1  ;;  %p648_p0 = scmp.ne.s32.totalorder %s410_s2, %s647_s5  ;;  %p653_p2 = scmp.lt.s32.totalorder %s647_s5, %s647_s5 }
  0x22   :  { %606 = vmatprep.mubr.msk.f32.mxu0 %vm670_vm0, %v669_v1  ;;  %567 = vmatprep.subr.mxu1 %v669_v1 }
  0x23   :  { %568 = vmatpush3.msra.mxu1 %v126_v32  ;;  %575 = vmatpush3.msra.mxu0 %v434_v34  ;;  %p654_p3 = por %p653_p2, %p652_p1 }
  0x24   :  { %569 = vmatprep.subr.mxu1 %v669_v1  ;;  %576 = vmatprep.subr.mxu0 %v669_v1 }
  0x25   :  { %570 = vmatpush3.msra.mxu1 %v125_v33  ;;  %577 = vmatpush3.msra.mxu0 %v433_v35  ;;  %p655_p4 = pnand %p654_p3, %p648_p0 }
  0x26   :  { %609 = vmatprep.subr.mxu1 %v669_v1  ;;  %578 = vmatprep.subr.mxu0 %v669_v1 }
  0x27   :  { %579 = vmatpush3.msra.mxu0 %v432_v36 }
  0x28   :  { %580 = vmatprep.subr.mxu0 %v669_v1 }
  0x29   :  { %581 = vmatpush3.msra.mxu0 %v431_v37 }
  0x2a   :  { %582 = vmatprep.subr.mxu0 %v669_v1 }
  0x2b   :  { %583 = vmatpush3.msra.mxu0 %v430_v38 }
  0x2c   :  { %584 = vmatprep.subr.mxu0 %v669_v1 }
  0x2d   :  { %585 = vmatpush3.msra.mxu0 %v429_v39 }
  0x2e   :  { %586 = vmatprep.subr.mxu0 %v669_v1 }
  0x2f   :  { %587 = vmatpush3.msra.mxu0 %v428_v40 }
  0x30   :  { %588 = vmatprep.subr.mxu0 %v669_v1 }
  0x31   :  { %589 = vmatpush3.msra.mxu0 %v427_v41 }
  0x32   :  { %590 = vmatprep.subr.mxu0 %v669_v1 }
  0x33   :  { %591 = vmatpush3.msra.mxu0 %v426_v42 }
  0x34   :  { %592 = vmatprep.subr.mxu0 %v669_v1 }
  0x35   :  { %593 = vmatpush3.msra.mxu0 %v425_v43 }
  0x36   :  { %594 = vmatprep.subr.mxu0 %v669_v1 }
  0x37   :  { %595 = vmatpush3.msra.mxu0 %v424_v44 }
  0x38   :  { %596 = vmatprep.subr.mxu0 %v669_v1 }
  0x39   :  { %597 = vmatpush3.msra.mxu0 %v423_v45 }
  0x3a   :  { %598 = vmatprep.subr.mxu0 %v669_v1 }
  0x3b   :  { %599 = vmatpush3.msra.mxu0 %v422_v46 }
  0x3c   :  { %600 = vmatprep.subr.mxu0 %v669_v1 }
  0x3d   :  { %601 = vmatpush3.msra.mxu0 %v421_v3 }
  0x3e   :  { %602 = vmatprep.subr.mxu0 %v669_v1 }
  0x3f   :  { %603 = vmatpush3.msra.mxu0 %v420_v5 }
  0x40   :  { %604 = vmatprep.subr.mxu0 %v669_v1 }
  0x41   :  { %605 = vmatpush3.msra.mxu0 %v419_v8 }
  0xe1   :  { %v120_v48 = vpop.f32.mrf.mxu0 }
  0xe2   :  { %v121_v49 = vadd.f32 %v417_v47, %v120_v48 }
  0xe3   :  { %v538_v50 = vpop.f32.mrf.mxu0 }
  0xe4   :  { %v124_v51 = vmax.f32 %v121_v49, 0.0 }
  0xe6   :  { %572 = vmatmul.mubr.f32.vlgmr.msra.gmra.mxu1 %v124_v51 }
  0xe7   :  { %610 = vmatpush3.msra.mxu1 %v235_v52  ;;  %641 = vmatprep.mubr.msk.f32.mxu1 %vm670_vm0, %v669_v1 }
  0xe8   :  { %611 = vmatprep.subr.mxu1 %v669_v1 }
  0xe9   :  { %612 = vmatpush3.msra.mxu1 %v234_v53 }
  0xea   :  { %613 = vmatprep.subr.mxu1 %v669_v1 }
  0xeb   :  { %614 = vmatpush3.msra.mxu1 %v233_v54 }
  0xec   :  { %615 = vmatprep.subr.mxu1 %v669_v1 }
  0xed   :  { %616 = vmatpush3.msra.mxu1 %v232_v55 }
  0xee   :  { %617 = vmatprep.subr.mxu1 %v669_v1 }
  0xef   :  { %618 = vmatpush3.msra.mxu1 %v231_v56 }
  0xf0   :  { %619 = vmatprep.subr.mxu1 %v669_v1 }
  0xf1   :  { %620 = vmatpush3.msra.mxu1 %v230_v57 }
  0xf2   :  { %621 = vmatprep.subr.mxu1 %v669_v1 }
  0xf3   :  { %622 = vmatpush3.msra.mxu1 %v229_v58 }
  0xf4   :  { %623 = vmatprep.subr.mxu1 %v669_v1 }
  0xf5   :  { %624 = vmatpush3.msra.mxu1 %v228_v59 }
  0xf6   :  { %625 = vmatprep.subr.mxu1 %v669_v1 }
  0xf7   :  { %626 = vmatpush3.msra.mxu1 %v227_v60 }
  0xf8   :  { %627 = vmatprep.subr.mxu1 %v669_v1 }
  0xf9   :  { %628 = vmatpush3.msra.mxu1 %v226_v61 }
  0xfa   :  { %629 = vmatprep.subr.mxu1 %v669_v1 }
  0xfb   :  { %630 = vmatpush3.msra.mxu1 %v225_v62 }
  0xfc   :  { %631 = vmatprep.subr.mxu1 %v669_v1 }
  0xfd   :  { %632 = vmatpush3.msra.mxu1 %v224_v63 }
  0xfe   :  { %633 = vmatprep.subr.mxu1 %v669_v1 }
  0xff   :  { %634 = vmatpush3.msra.mxu1 %v223_v0 }
 0x100   :  { %635 = vmatprep.subr.mxu1 %v669_v1 }
 0x101   :  { %636 = vmatpush3.msra.mxu1 %v222_v2 }
 0x102   :  { %637 = vmatprep.subr.mxu1 %v669_v1 }
 0x103   :  { %638 = vmatpush3.msra.mxu1 %v221_v4 }
 0x104   :  { %639 = vmatprep.subr.mxu1 %v669_v1  ;;  %v435_v1 = vld [vmem:[%s1006_s7] ss:$0 sm:$0xff] }
 0x105   :  { %640 = vmatpush3.msra.mxu1 %v220_v6 }
 0x106   :  { %642 = vmatmul.mubr.f32.vlgmr.msra.gmra.mxu1 %v219_v7 }
 0x1a6   :  { %v214_v10 = vpop.f32.mrf.mxu1 }
 0x1a7   :  { %v215_v11 = vadd.f32 %v418_v9, %v214_v10 }
 0x1a8   :  { %v573_v12 = vpop.f32.mrf.mxu1 }
 0x1a9   :  { %v218_v13 = vmax.f32 %v215_v11, 0.0 }
 0x1ab   :  { %607 = vmatmul.mubr.f32.vlgmr.msra.gmra.mxu0 %v218_v13 }
 0x1c6   :  { %v389_v14 = vpop.f32.mrf.mxu1 }
 0x1c8   :  { %v643_v15 = vpop.f32.mrf.mxu1 }
 0x26b   :  { %v319_v16 = vpop.f32.mrf.mxu0 }
 0x26c   :  { %v390_v17 = vadd.f32 %v389_v14, %v319_v16 }
 0x26d   :  { %v608_v18 = vpop.f32.mrf.mxu0 }
 0x26e   :  { %v400_v19 = vadd.f32 %v435_v1, %v390_v17 }
 0x270   :  { %v401_v20 = vmax.f32 %v400_v19, 0.0 }
 0x272   :  { %402 = vst [vmem:[#allocation2] sm:$0xff] %v401_v20 }
 0x273   :  { %658 = shalt.err (!%p655_p4)
}
 0x274   :  { %412 = dma.vmem_to_hbm [thread:$0]  %s410_s2, 128, %s1007_s8, [#allocation3]  }
 0x275   :  { %667 = dma.done.wait [#allocation3], 128  }
 0x276   :  { %668 = vsyncadd [#allocation3], 4294967168 }
 0x277   :  { %416 = vsyncpa [#allocation3], 1 }

</bundles_post_ra>
